<compile_context>
chip_gen: v5e
topology: v5e:2x2
jax: 0.10.0
libtpu: 0.0.40
codegen_flags: <defaults>
</compile_context>

<pallas_src>
import jax
import jax.numpy as jnp
from jax.experimental import pallas as pl
from jax.experimental.pallas import tpu as pltpu

BN_EPS = 1e-5
LANE = 128
DEFAULT_TB = 1024   # safe with f32 x tiles on v7x (64 MiB VMEM); v5e/v6e can use 2048.


def _round_up(x, m):
    return ((x + m - 1) // m) * m


def _fc2_classifier_kernel(x_ref, w1_ref, b1_ref, w2_ref, b2_ref, out_ref):
    # Cast x to bf16 in-kernel (the tile is DMA'd in its native dtype).
    x = x_ref[...].astype(jnp.bfloat16)
    # fc1 with eval-mode BN folded into w1/b1 (bf16 MXU feeds, f32 accumulation).
    h = jnp.dot(x, w1_ref[...], preferred_element_type=jnp.float32)     # [TB, C1]
    h = jnp.maximum(h + b1_ref[...], 0.0)                               # +bias, ReLU
    # fc2 with 1/temperature pre-folded, output lane-padded to 128.
    out = jnp.dot(h.astype(jnp.bfloat16), w2_ref[...],
                  preferred_element_type=jnp.float32)                   # [TB, C2p]
    out_ref[...] = (out + b2_ref[...]).astype(out_ref.dtype)            # bf16 store


def fold_params(params, temperature=1.0):
    """One-time (model-load) weight prep: fold BN + temperature, pad, cast."""
    scale = params["gamma"] * jax.lax.rsqrt(params["var"] + BN_EPS)          # [1, C1]
    w1 = (params["w1"] * scale).astype(jnp.bfloat16)                         # [C0, C1]
    b1 = ((params["b1"] - params["mean"]) * scale + params["beta"]).astype(jnp.float32)

    C1, C2 = params["w2"].shape
    C2p = _round_up(C2, LANE)
    inv_t = jnp.float32(1.0 / float(temperature))
    w2 = jnp.zeros((C1, C2p), jnp.float32).at[:, :C2].set(params["w2"] * inv_t)
    b2 = jnp.zeros((1, C2p), jnp.float32).at[:, :C2].set(params["b2"] * inv_t)

    return {"w1": w1, "b1": b1,
            "w2": w2.astype(jnp.bfloat16), "b2": b2,
            "n_classes": C2}


def fc2_classifier_forward(x, folded, *, block_b=DEFAULT_TB):
    """Fused forward pass of FC2Classifier (eval-mode semantics).

    x: [B, C0] (any float dtype; cast to bf16 inside the kernel).
    folded: output of fold_params().
    """
    B, C0 = x.shape
    C1 = folded["w1"].shape[1]
    C2p = folded["w2"].shape[1]
    C2 = folded["n_classes"]

    # Batch tile: large enough to amortize per-step overhead, but small enough
    # that there are >= 2 grid steps when B allows it (keeps both v7x
    # TensorCores busy via the "parallel" batch axis).
    TB = min(block_b, max(16, _round_up(pl.cdiv(B, 2), 16)))
    grid_b = pl.cdiv(B, TB)   # ragged last block: Pallas masks OOB rows.

    x_isz = jnp.dtype(x.dtype).itemsize
    # VMEM: double-buffered x / out tiles + (default double-buffered) weights.
    vmem_est = (2 * TB * C0 * x_isz + 2 * TB * C2p * 2
                + 2 * (C0 * C1 + C1 * C2p) * 2 + 2 * (C1 + C2p) * 4)
    vmem_limit = int(min(max(32 << 20, vmem_est * 5 // 4 + (2 << 20)), 64 << 20))

    cost = pl.CostEstimate(
        flops=2 * B * (C0 * C1 + C1 * C2p),
        transcendentals=0,
        bytes_accessed=(B * C0 * x_isz + 2 * (C0 * C1 + C1 * C2p)
                        + 4 * (C1 + C2p) + 2 * B * C2p))

    out = pl.pallas_call(
        _fc2_classifier_kernel,
        out_shape=jax.ShapeDtypeStruct((B, C2p), jnp.bfloat16),
        grid=(grid_b,),
        in_specs=[
            pl.BlockSpec((TB, C0), lambda i: (i, 0)),     # x tile (pipelined)
            pl.BlockSpec((C0, C1), lambda i: (0, 0)),     # w1  (resident)
            pl.BlockSpec((1, C1), lambda i: (0, 0)),      # b1  (resident)
            pl.BlockSpec((C1, C2p), lambda i: (0, 0)),    # w2  (resident)
            pl.BlockSpec((1, C2p), lambda i: (0, 0)),     # b2  (resident)
        ],
        out_specs=pl.BlockSpec((TB, C2p), lambda i: (i, 0)),
        compiler_params=pltpu.CompilerParams(
            dimension_semantics=("parallel",),
            vmem_limit_bytes=vmem_limit),
        cost_estimate=cost,
    )(x, folded["w1"], folded["b1"], folded["w2"], folded["b2"])

    # Slice off the lane padding; tiny [B, C2] cast back to f32 logits.
    return out[:, :C2].astype(jnp.float32)


def make_params(key, channels=(256, 128, 12)):
    """Deterministic synthetic parameters matching FC2Classifier shapes."""
    c0, c1, c2 = channels
    k = jax.random.split(key, 6)
    params = {
        "w1": jax.random.normal(k[0], (c0, c1), jnp.float32) * (1.0 / jnp.sqrt(c0)),
        "b1": jax.random.normal(k[1], (1, c1), jnp.float32) * 0.01,
        "gamma": jnp.ones((1, c1), jnp.float32)
                 + 0.1 * jax.random.normal(k[2], (1, c1), jnp.float32),
        "beta": 0.1 * jax.random.normal(k[3], (1, c1), jnp.float32),
        "mean": 0.05 * jax.random.normal(k[4], (1, c1), jnp.float32),
        "var": jnp.abs(jax.random.normal(k[5], (1, c1), jnp.float32)) + 0.5,
        "w2": jax.random.normal(jax.random.fold_in(key, 7), (c1, c2), jnp.float32)
              * (1.0 / jnp.sqrt(c1)),
        "b2": 0.01 * jax.random.normal(jax.random.fold_in(key, 8), (1, c2), jnp.float32),
    }
    return params


def reference_forward(x, params, *, temperature=1.0):
    """Pure-JAX f32 reference (eval-mode PyTorch semantics)."""
    h = x @ params["w1"] + params["b1"]
    h = (h - params["mean"]) * (params["gamma"] /
                                jnp.sqrt(params["var"] + BN_EPS)) + params["beta"]
    h = jnp.maximum(h, 0.0)
    out = h @ params["w2"] + params["b2"]
    return out / temperature


if __name__ == "__main__":
    key = jax.random.PRNGKey(0)
    channels = (256, 128, 12)   # small version of the default (2048, 256, 12)
    temperature = 2.0
    B = 8

    kx, kp = jax.random.split(key)
    x = jax.random.normal(kx, (B, channels[0]), jnp.float32)
    params = make_params(kp, channels)

    # Weight prep hoisted out of the per-call path (model-load time).
    folded = fold_params(params, temperature=temperature)

    out = fc2_classifier_forward(x, folded)
    out = jax.block_until_ready(out)

    ref = reference_forward(x, params, temperature=temperature)
    assert out.shape == (B, channels[-1])
    # bf16 MXU feeds + bf16 output store -> relaxed tolerance vs f32 reference.
    assert jnp.allclose(out, ref, atol=5e-2, rtol=5e-2), "mismatch vs reference"

    print("KERNEL_OK")
</pallas_src>

<mosaic_0001>
module attributes {stable_mosaic.version = 11 : i64} {
  func.func @_fc2_classifier_kernel(%arg0: i32, %arg1: memref<16x256xf32, #tpu.memory_space<vmem>>, %arg2: memref<256x128xbf16, #tpu.memory_space<vmem>>, %arg3: memref<1x128xf32, #tpu.memory_space<vmem>>, %arg4: memref<128x128xbf16, #tpu.memory_space<vmem>>, %arg5: memref<1x128xf32, #tpu.memory_space<vmem>>, %arg6: memref<16x128xbf16, #tpu.memory_space<vmem>>) attributes {dimension_semantics = [#tpu.dimension_semantics<parallel>], iteration_bounds = array<i64: 1>, scalar_prefetch = 0 : i64, scratch_operands = 0 : i64, tpu.core_type = #tpu.core_type<tc>, window_params = [{transform_indices = @transform_0, window_bounds = array<i64: 16, 256>}, {pipeline_mode = #tpu.pipeline_mode<synchronous>, transform_indices = @transform_1, window_bounds = array<i64: 256, 128>}, {pipeline_mode = #tpu.pipeline_mode<synchronous>, transform_indices = @transform_2, window_bounds = array<i64: 1, 128>}, {pipeline_mode = #tpu.pipeline_mode<synchronous>, transform_indices = @transform_3, window_bounds = array<i64: 128, 128>}, {pipeline_mode = #tpu.pipeline_mode<synchronous>, transform_indices = @transform_4, window_bounds = array<i64: 1, 128>}, {transform_indices = @transform_5, window_bounds = array<i64: 16, 128>}]} {
    %c0 = arith.constant 0 : index
    %c0_0 = arith.constant 0 : index
    %0 = vector.load %arg1[%c0, %c0_0] : memref<16x256xf32, #tpu.memory_space<vmem>>, vector<16x256xf32>
    %1 = arith.truncf %0 : vector<16x256xf32> to vector<16x256xbf16>
    %c0_1 = arith.constant 0 : index
    %c0_2 = arith.constant 0 : index
    %2 = vector.load %arg2[%c0_1, %c0_2] : memref<256x128xbf16, #tpu.memory_space<vmem>>, vector<256x128xbf16>
    %cst = arith.constant dense<0.000000e+00> : vector<16x128xf32>
    %3 = tpu.matmul %1, %2, %cst {dimension_numbers = #tpu.dot_dimension_numbers<[1], [0], [0], [1], [0, 0, 1, 1], [], []>} : vector<16x256xbf16>, vector<256x128xbf16>, vector<16x128xf32> -> vector<16x128xf32>
    %c0_3 = arith.constant 0 : index
    %c0_4 = arith.constant 0 : index
    %4 = vector.load %arg3[%c0_3, %c0_4] : memref<1x128xf32, #tpu.memory_space<vmem>>, vector<1x128xf32>
    %5 = vector.broadcast %4 : vector<1x128xf32> to vector<16x128xf32>
    %6 = arith.addf %3, %5 : vector<16x128xf32>
    %cst_5 = arith.constant 0.000000e+00 : f32
    %7 = vector.broadcast %cst_5 : f32 to vector<16x128xf32>
    %8 = arith.maximumf %6, %7 : vector<16x128xf32>
    %9 = arith.truncf %8 : vector<16x128xf32> to vector<16x128xbf16>
    %c0_6 = arith.constant 0 : index
    %c0_7 = arith.constant 0 : index
    %10 = vector.load %arg4[%c0_6, %c0_7] : memref<128x128xbf16, #tpu.memory_space<vmem>>, vector<128x128xbf16>
    %cst_8 = arith.constant dense<0.000000e+00> : vector<16x128xf32>
    %11 = tpu.matmul %9, %10, %cst_8 {dimension_numbers = #tpu.dot_dimension_numbers<[1], [0], [0], [1], [0, 0, 1, 1], [], []>} : vector<16x128xbf16>, vector<128x128xbf16>, vector<16x128xf32> -> vector<16x128xf32>
    %c0_9 = arith.constant 0 : index
    %c0_10 = arith.constant 0 : index
    %12 = vector.load %arg5[%c0_9, %c0_10] : memref<1x128xf32, #tpu.memory_space<vmem>>, vector<1x128xf32>
    %13 = vector.broadcast %12 : vector<1x128xf32> to vector<16x128xf32>
    %14 = arith.addf %11, %13 : vector<16x128xf32>
    %15 = arith.truncf %14 : vector<16x128xf32> to vector<16x128xbf16>
    %c0_11 = arith.constant 0 : index
    %c0_12 = arith.constant 0 : index
    %16 = vector.load %arg6[%c0_11, %c0_12] : memref<16x128xbf16, #tpu.memory_space<vmem>>, vector<16x128xbf16>
    tpu.vector_store %arg6[%c0_11, %c0_12], %15 {strides = array<i32>} : memref<16x128xbf16, #tpu.memory_space<vmem>>, vector<16x128xbf16>,
    return
  }
  func.func @transform_0(%arg0: i32) -> (i32, i32) {
    %c0_i32 = arith.constant 0 : i32
    %c0_i32_0 = arith.constant 0 : i32
    return %arg0, %c0_i32 : i32, i32
  }
  func.func @transform_1(%arg0: i32) -> (i32, i32) {
    %c0_i32 = arith.constant 0 : i32
    %c0_i32_0 = arith.constant 0 : i32
    %c0_i32_1 = arith.constant 0 : i32
    return %c0_i32, %c0_i32_0 : i32, i32
  }
  func.func @transform_2(%arg0: i32) -> (i32, i32) {
    %c0_i32 = arith.constant 0 : i32
    %c0_i32_0 = arith.constant 0 : i32
    %c0_i32_1 = arith.constant 0 : i32
    return %c0_i32, %c0_i32_0 : i32, i32
  }
  func.func @transform_3(%arg0: i32) -> (i32, i32) {
    %c0_i32 = arith.constant 0 : i32
    %c0_i32_0 = arith.constant 0 : i32
    %c0_i32_1 = arith.constant 0 : i32
    return %c0_i32, %c0_i32_0 : i32, i32
  }
  func.func @transform_4(%arg0: i32) -> (i32, i32) {
    %c0_i32 = arith.constant 0 : i32
    %c0_i32_0 = arith.constant 0 : i32
    %c0_i32_1 = arith.constant 0 : i32
    return %c0_i32, %c0_i32_0 : i32, i32
  }
  func.func @transform_5(%arg0: i32) -> (i32, i32) {
    %c0_i32 = arith.constant 0 : i32
    %c0_i32_0 = arith.constant 0 : i32
    return %arg0, %c0_i32 : i32, i32
  }
}

</mosaic_0001>

<bundles_post_ra>
// kernel: tpu_custom_call.1
= control target key start
LH: loop header
LB: loop body
LE: loop exit
PB: predicated region body
PF: predicated region fallthrough
CT: control target
= control target key end

     0   :  { %10 = vsyncpa [#allocation3], 0  ;;  %s645_s0 = inlined_call_operand.hbm [shape: f32[8,256], index: 0, kind: input, shape index: {}]   ;;  %s646_s1 = inlined_call_operand.hbm [shape: bf16[256,128], index: 1, kind: input, shape index: {}]   ;;  %s647_s2 = inlined_call_operand.vmem [shape: f32[1,128], index: 2, kind: input, shape index: {}]   ;;  %s648_s3 = inlined_call_operand.hbm [shape: bf16[128,128], index: 3, kind: input, shape index: {}]   ;;  %s649_s4 = inlined_call_operand.vmem [shape: f32[1,128], index: 4, kind: input, shape index: {}]   ;;  %s650_s5 = inlined_call_operand.hbm [shape: bf16[8,128], index: 5, kind: output, shape index: {}]  }
   0x1   :  { %11 = vsyncpa [#allocation6], 0 }
   0x2   :  { %12 = vsyncpa [#allocation4], 0  ;;  %s30_s20 = sshll.u32 %s646_s1, 4  ;;  %s31_s20 = int_to_ptr.hbm [resolvable:$true] %s30_s20 }
   0x3   :  { %16 = vsyncadd [#allocation3], 256  ;;  %s580_s21 = smov [#allocation5]   ;;  %s17_s25 = sshll.u32 %s645_s0, 4  ;;  %s18_s25 = int_to_ptr.hbm [resolvable:$true] %s17_s25 }
   0x4   :  { %s32_s22 = sshll.u32 %s580_s21, 4  ;;  %s581_s26 = smov 64   ;;  %s33_s22 = int_to_ptr.vmem [resolvable:$true] %s32_s22 }
   0x5   :  { %s582_s27 = smov 4   ;;  %s583_s28 = smov [#allocation2]  }
   0x6   :  { %38 = dma.hbm_to_vmem [thread:$0]  %s31_s20, 2048, %s33_s22, [#allocation6], %s581_s26, %s581_s26, %s582_s27  }
   0x7   :  { %s19_s29 = sshll.u32 %s583_s28, 4  ;;  %s584_s1 = smov 256   ;;  %s20_s29 = int_to_ptr.vmem [resolvable:$true] %s19_s29 }
   0x8   :  { %s585_s30 = smov 16   ;;  %s45_s8 = sshll.u32 %s648_s3, 4  ;;  %s46_s8 = int_to_ptr.hbm [resolvable:$true] %s45_s8 }
   0x9   :  { %25 = dma.hbm_to_vmem [thread:$0]  %s18_s25, 256, %s20_s29, [#allocation3], %s584_s1, %s584_s1, %s585_s30  }
   0xa   :  { %s586_s9 = smov [#allocation7]  }
   0xb   :  { %s47_s0 = sshll.u32 %s586_s9, 4  ;;  %s48_s0 = int_to_ptr.vmem [resolvable:$true] %s47_s0 }
   0xc   :  { %53 = dma.hbm_to_vmem [thread:$0]  %s46_s8, 1024, %s48_s0, [#allocation6], %s581_s26, %s581_s26, %s582_s27  }
   0xd   :  { %574 = dma.done.wait [#allocation3], 512  }
   0xe   :  { %575 = vsyncadd [#allocation3], 4294966784 }
   0xf   :  { %576 = dma.done.wait [#allocation6], 3072  }
  0x10   :  { %577 = vsyncadd [#allocation6], 4294964224  ;;  %v446_v0 = vld [vmem:[#allocation5 + $0x38] sm:$0xff]  ;;  %v445_v2 = vld [vmem:[#allocation5 + $0x30] sm:$0xff] }
  0x11   :  { %v454_v1 = vld [vmem:[#allocation5 + $0x78] sm:$0xff]  ;;  %206 = vmatpush.bf16.msra.mxu0 %v446_v0  ;;  %v453_v3 = vld [vmem:[#allocation5 + $0x70] sm:$0xff]  ;;  %v444_v4 = vld [vmem:[#allocation5 + $0x28] sm:$0xff] }
  0x12   :  { %220 = vmatpush.bf16.msra.mxu1 %v454_v1  ;;  %v452_v5 = vld [vmem:[#allocation5 + $0x68] sm:$0xff]  ;;  %v462_v6 = vld [vmem:[#allocation7 + $0x38] sm:$0xff]  ;;  %v461_v7 = vld [vmem:[#allocation7 + $0x30] sm:$0xff] }
  0x13   :  { %305 = vmatpush.bf16.msra.mxu2 %v462_v6  ;;  %v443_v8 = vld [vmem:[#allocation5 + $0x20] sm:$0xff]  ;;  %v460_v10 = vld [vmem:[#allocation7 + $0x28] sm:$0xff]  ;;  %v442_v11 = vld [vmem:[#allocation5 + $0x18] sm:$0xff] }
  0x14   :  { %v451_v9 = vld [vmem:[#allocation5 + $0x60] sm:$0xff]  ;;  %v450_v12 = vld [vmem:[#allocation5 + $0x58] sm:$0xff]  ;;  %v441_v14 = vld [vmem:[#allocation5 + $0x10] sm:$0xff] }
  0x15   :  { %207 = vmatpush.bf16.msra.mxu0 %v445_v2  ;;  %v459_v13 = vld [vmem:[#allocation7 + $0x20] sm:$0xff]  ;;  %v449_v15 = vld [vmem:[#allocation5 + $0x50] sm:$0xff]  ;;  %v440_v16 = vld [vmem:[#allocation5 + $0x8] sm:$0xff] }
  0x16   :  { %221 = vmatpush.bf16.msra.mxu1 %v453_v3  ;;  %v448_v17 = vld [vmem:[#allocation5 + $0x48] sm:$0xff]  ;;  %v439_v18 = vld [vmem:[#allocation5] sm:$0xff]  ;;  %v70_v21 = vld [vmem:[#allocation2 + $0x10] sm:$0xff] }
  0x17   :  { %306 = vmatpush.bf16.msra.mxu2 %v461_v7  ;;  %v447_v19 = vld [vmem:[#allocation5 + $0x40] sm:$0xff]  ;;  %v69_v22 = vld [vmem:[#allocation2 + $0x8] sm:$0xff]  ;;  %v71_v23 = vld [vmem:[#allocation2 + $0x18] sm:$0xff] }
  0x18   :  { %v68_v20 = vld [vmem:[#allocation2] sm:$0xff]  ;;  %v73_v25 = vpack.c.bf16 %v71_v23, %v69_v22  ;;  %v458_v26 = vld [vmem:[#allocation7 + $0x18] sm:$0xff]  ;;  %v457_v27 = vld [vmem:[#allocation7 + $0x10] sm:$0xff] }
  0x19   :  { %208 = vmatpush.bf16.msra.mxu0 %v444_v4  ;;  %v72_v24 = vpack.c.bf16 %v70_v21, %v68_v20  ;;  %v456_v28 = vld [vmem:[#allocation7 + $0x8] sm:$0xff]  ;;  %v455_v29 = vld [vmem:[#allocation7] sm:$0xff] }
  0x1a   :  { %222 = vmatpush.bf16.msra.mxu1 %v452_v5  ;;  %v476_v32 = vld [vmem:[%s647_s2] ss:$0 sm:$0xff] }
  0x1b   :  { %307 = vmatpush.bf16.msra.mxu2 %v460_v10  ;;  %v477_v43 = vld [vmem:[%s649_s4] ss:$0 sm:$0xff] }
  0x1d   :  { %209 = vmatpush.bf16.msra.mxu0 %v443_v8 }
  0x1e   :  { %223 = vmatpush.bf16.msra.mxu1 %v451_v9 }
  0x1f   :  { %308 = vmatpush.bf16.msra.mxu2 %v459_v13 }
  0x21   :  { %210 = vmatpush.bf16.msra.mxu0 %v442_v11 }
  0x22   :  { %224 = vmatpush.bf16.msra.mxu1 %v450_v12 }
  0x23   :  { %309 = vmatpush.bf16.msra.mxu2 %v458_v26 }
  0x25   :  { %211 = vmatpush.bf16.msra.mxu0 %v441_v14 }
  0x26   :  { %225 = vmatpush.bf16.msra.mxu1 %v449_v15 }
  0x27   :  { %310 = vmatpush.bf16.msra.mxu2 %v457_v27 }
  0x29   :  { %212 = vmatpush.bf16.msra.mxu0 %v440_v16 }
  0x2a   :  { %226 = vmatpush.bf16.msra.mxu1 %v448_v17 }
  0x2b   :  { %311 = vmatpush.bf16.msra.mxu2 %v456_v28 }
  0x2d   :  { %213 = vmatpush.bf16.msra.mxu0 %v439_v18 }
  0x2e   :  { %227 = vmatpush.bf16.msra.mxu1 %v447_v19 }
  0x2f   :  { %312 = vmatpush.bf16.msra.mxu2 %v455_v29 }
  0x30   :  { %214 = vmatmul.bf16.vlgmr.msra.gmra.mxu0 %v72_v24 }
  0x31   :  { %228 = vmatmul.bf16.vlgmr.msra.gmra.mxu1 %v73_v25 }
  0xad   :  { %v215_v30 = vpop.f32.mrf.mxu0 }
  0xae   :  { %v229_v31 = vpop.f32.mrf.mxu1  ;;  %v216_v33 = vadd.f32 %v476_v32, %v215_v30 }
  0xb0   :  { %v230_v35 = vadd.f32 %v229_v31, %v216_v33 }
  0xb2   :  { %v234_v39 = vmax.f32 %v230_v35, 0.0 }
  0xb5   :  { %v217_v34 = vpop.f32.mrf.mxu0 }
  0xb6   :  { %v218_v36 = vadd.f32 %v476_v32, %v217_v34  ;;  %v231_v37 = vpop.f32.mrf.mxu1 }
  0xb8   :  { %v232_v38 = vadd.f32 %v231_v37, %v218_v36 }
  0xba   :  { %v235_v40 = vmax.f32 %v232_v38, 0.0 }
  0xbc   :  { %v236_v41 = vpack.c.bf16 %v235_v40, %v234_v39 }
  0xbe   :  { %313 = vmatmul.bf16.vlgmr.msra.gmra.mxu2 %v236_v41 }
 0x141   :  { %v314_v42 = vpop.f32.mrf.mxu2 }
 0x142   :  { %v315_v45 = vadd.f32 %v477_v43, %v314_v42 }
 0x149   :  { %v316_v44 = vpop.f32.mrf.mxu2 }
 0x14a   :  { %v317_v46 = vadd.f32 %v477_v43, %v316_v44 }
 0x14c   :  { %v466_v47 = vpack.c.bf16 %v317_v46, %v315_v45 }
 0x14e   :  { %467 = vst [vmem:[#allocation8] sm:$0xff] %v466_v47  }
 0x14f   :  { %326 = vsyncadd [#allocation4], 64  ;;  %s329_s14 = sshll.u32 %s650_s5, 4  ;;  %s587_s15 = smov [#allocation8]   ;;  %s330_s14 = int_to_ptr.hbm [resolvable:$true] %s329_s14 }
 0x150   :  { %s327_s16 = sshll.u32 %s587_s15, 4  ;;  %s328_s16 = int_to_ptr.vmem [resolvable:$true] %s327_s16 }
 0x151   :  { %335 = dma.vmem_to_hbm [thread:$0]  %s328_s16, 64, %s330_s14, [#allocation4], %s581_s26, %s581_s26, %s582_s27  }
 0x152   :  { %578 = dma.done.wait [#allocation4], 128  }
 0x153   :  { %579 = vsyncadd [#allocation4], 4294967168 }
 0x154   :  { %340 = vsyncpa [#allocation3], 1 }
 0x155   :  { %341 = vsyncpa [#allocation6], 1 }
 0x156   :  { %342 = vsyncpa [#allocation4], 1 }

</bundles_post_ra>
